<compile_context>
chip_gen: v5e
topology: v5e:2x2
jax: 0.10.0
libtpu: 0.0.40
codegen_flags: <defaults>
</compile_context>

<pallas_src>
import math

import jax
import jax.numpy as jnp
from jax.experimental import pallas as pl
from jax.experimental.pallas import tpu as pltpu

INPUT_SIZE = 4
HIDDEN_SIZE = 4
OUTPUT_SIZE = 2

SUBLANES = 8                    # sublanes per batch tile
LANES = 128                     # lanes per batch tile
BATCH_TILE = SUBLANES * LANES   # 1024 batch elements per grid step

# (in_features, out_features) per layer; weights packed row-major, then bias.
_LAYER_DIMS = (
    (INPUT_SIZE, HIDDEN_SIZE),
    (HIDDEN_SIZE, HIDDEN_SIZE),
    (HIDDEN_SIZE, HIDDEN_SIZE),
    (HIDDEN_SIZE, OUTPUT_SIZE),
)


def _param_offsets():
    offs, o = [], 0
    for fin, fout in _LAYER_DIMS:
        offs.append((o, o + fin * fout))  # (weight offset, bias offset)
        o += fin * fout + fout
    return tuple(offs), o


_OFFSETS, _N_PARAMS = _param_offsets()  # 70 scalars total


def _dqn_kernel(p_ref, x_ref, out_ref):
    """p_ref: (70,) f32 SMEM.
    x_ref:   (INPUT_SIZE,  SUBLANES, LANES) VMEM  -- one full vreg per feature.
    out_ref: (OUTPUT_SIZE, SUBLANES, LANES) VMEM.
    """
    # Per-feature activation vregs, each (SUBLANES, LANES) = one full f32 vreg.
    rows = [x_ref[i] for i in range(INPUT_SIZE)]

    n_layers = len(_LAYER_DIMS)
    for layer, (fin, fout) in enumerate(_LAYER_DIMS):
        w_off, b_off = _OFFSETS[layer]
        is_last = layer == n_layers - 1
        new_rows = []
        for j in range(fout):
            # Bias folded into the accumulator init; scalar-weight VPU FMAs.
            acc = rows[0] * p_ref[w_off + j] + p_ref[b_off + j]
            for i in range(1, fin):
                acc = acc + rows[i] * p_ref[w_off + i * fout + j]
            if not is_last:
                acc = jnp.maximum(acc, 0.0)  # relu (dropout = identity, eval)
            new_rows.append(acc)
        rows = new_rows

    for j in range(OUTPUT_SIZE):
        out_ref[j] = rows[j]


def _fold_batchnorm(params, apply_bn):
    """Return per-layer (w, b) with eval-mode BN folded in when requested."""
    layers = []
    for idx in range(1, 5):
        w = params[f"w{idx}"]
        b = params[f"b{idx}"].reshape(-1)
        if apply_bn and idx <= 3:  # bn1..bn3 only, and only when B > 256
            eps = 1e-5
            gamma = params[f"bn{idx}_gamma"]
            beta = params[f"bn{idx}_beta"]
            mean = params[f"bn{idx}_mean"]
            var = params[f"bn{idx}_var"]
            scale = gamma * jax.lax.rsqrt(var + eps)
            w = w * scale[None, :]
            b = (b - mean) * scale + beta
        layers.append((w.astype(jnp.float32), b.astype(jnp.float32)))
    return layers


def blackjack_dqn_forward(x, params):
    """x: (B, INPUT_SIZE); returns (B, OUTPUT_SIZE) float32 Q-values."""
    B = x.shape[0]
    x = x.astype(jnp.float32)

    # B > 256 is a static (shape-based) decision, exactly like the PyTorch code.
    layers = _fold_batchnorm(params, apply_bn=(B > 256))
    packed = jnp.concatenate(
        [jnp.concatenate([w.reshape(-1), b.reshape(-1)]) for (w, b) in layers])

    # Feature-major, (sublane, lane)-tiled activation slab.
    Bp = max(BATCH_TILE, -(-B // BATCH_TILE) * BATCH_TILE)
    x_fm = jnp.zeros((INPUT_SIZE, Bp), jnp.float32).at[:, :B].set(x.T)
    x_fm = x_fm.reshape(INPUT_SIZE, Bp // LANES, LANES)

    out_fm = pl.pallas_call(
        _dqn_kernel,
        out_shape=jax.ShapeDtypeStruct((OUTPUT_SIZE, Bp // LANES, LANES),
                                       jnp.float32),
        grid=(Bp // BATCH_TILE,),
        in_specs=[
            pl.BlockSpec(memory_space=pltpu.MemorySpace.SMEM),  # packed params
            pl.BlockSpec((INPUT_SIZE, SUBLANES, LANES),
                         lambda i: (0, i, 0)),                  # x tile
        ],
        out_specs=pl.BlockSpec((OUTPUT_SIZE, SUBLANES, LANES),
                               lambda i: (0, i, 0)),
        compiler_params=pltpu.CompilerParams(
            dimension_semantics=("parallel",)),
    )(packed, x_fm)

    return out_fm.reshape(OUTPUT_SIZE, Bp)[:, :B].T


def init_params(key, *, nontrivial_bn=False):
    """PyTorch-Linear-style init; weights stored transposed (in, out)."""
    def linear(k, fan_in, fan_out):
        kw, kb = jax.random.split(k)
        bound = 1.0 / math.sqrt(fan_in)
        w = jax.random.uniform(kw, (fan_in, fan_out), jnp.float32, -bound, bound)
        b = jax.random.uniform(kb, (fan_out,), jnp.float32, -bound, bound)
        return w, b

    k1, k2, k3, k4, kbn = jax.random.split(key, 5)
    p = {}
    for idx, (k, (fin, fout)) in enumerate(
            zip((k1, k2, k3, k4), _LAYER_DIMS), start=1):
        w, b = linear(k, fin, fout)
        p[f"w{idx}"], p[f"b{idx}"] = w, b

    # BatchNorm1d parameters / running stats (used only when B > 256).
    for idx in range(1, 4):
        if nontrivial_bn:
            kg, kb2, km, kv, kbn = jax.random.split(kbn, 5)
            p[f"bn{idx}_gamma"] = jax.random.uniform(kg, (HIDDEN_SIZE,), jnp.float32, 0.5, 1.5)
            p[f"bn{idx}_beta"] = jax.random.uniform(kb2, (HIDDEN_SIZE,), jnp.float32, -0.5, 0.5)
            p[f"bn{idx}_mean"] = jax.random.uniform(km, (HIDDEN_SIZE,), jnp.float32, -0.5, 0.5)
            p[f"bn{idx}_var"] = jax.random.uniform(kv, (HIDDEN_SIZE,), jnp.float32, 0.5, 1.5)
        else:  # PyTorch defaults
            p[f"bn{idx}_gamma"] = jnp.ones((HIDDEN_SIZE,), jnp.float32)
            p[f"bn{idx}_beta"] = jnp.zeros((HIDDEN_SIZE,), jnp.float32)
            p[f"bn{idx}_mean"] = jnp.zeros((HIDDEN_SIZE,), jnp.float32)
            p[f"bn{idx}_var"] = jnp.ones((HIDDEN_SIZE,), jnp.float32)
    return p


def _reference(x, params):
    """Pure-JAX reference mirroring the PyTorch forward (eval mode)."""
    B = x.shape[0]
    h = x.astype(jnp.float32)
    eps = 1e-5
    for idx in range(1, 4):
        h = h @ params[f"w{idx}"] + params[f"b{idx}"]
        if B > 256:
            h = (params[f"bn{idx}_gamma"] * (h - params[f"bn{idx}_mean"])
                 * jax.lax.rsqrt(params[f"bn{idx}_var"] + eps)
                 + params[f"bn{idx}_beta"])
        h = jnp.maximum(h, 0.0)
    return h @ params["w4"] + params["b4"]


if __name__ == "__main__":
    key = jax.random.PRNGKey(0)
    k_p1, k_x1, k_p2, k_x2 = jax.random.split(key, 4)

    # Case 1: small batch (B <= 256) -> BatchNorm branch statically skipped.
    params = init_params(k_p1)
    x_small = jax.random.normal(k_x1, (8, INPUT_SIZE), jnp.float32)
    out_small = jax.block_until_ready(blackjack_dqn_forward(x_small, params))
    exp_small = _reference(x_small, params)
    assert out_small.shape == (8, OUTPUT_SIZE), out_small.shape
    assert jnp.allclose(out_small, exp_small, atol=1e-5, rtol=1e-5), \
        "small-batch mismatch vs reference"

    # Case 2: large batch (B > 256) -> eval-mode BN folded in.
    params_bn = init_params(k_p2, nontrivial_bn=True)
    x_big = jax.random.normal(k_x2, (300, INPUT_SIZE), jnp.float32)
    out_big = jax.block_until_ready(blackjack_dqn_forward(x_big, params_bn))
    exp_big = _reference(x_big, params_bn)
    assert out_big.shape == (300, OUTPUT_SIZE), out_big.shape
    assert jnp.allclose(out_big, exp_big, atol=1e-4, rtol=1e-4), \
        "large-batch (BN) mismatch vs reference"

    print("KERNEL_OK")
</pallas_src>

<mosaic_0001>
module attributes {stable_mosaic.version = 11 : i64} {
  func.func @_dqn_kernel(%arg0: i32, %arg1: memref<70xf32, #tpu.memory_space<smem>>, %arg2: memref<4x8x128xf32, #tpu.memory_space<vmem>>, %arg3: memref<2x8x128xf32, #tpu.memory_space<vmem>>) attributes {dimension_semantics = [#tpu.dimension_semantics<parallel>], iteration_bounds = array<i64: 1>, scalar_prefetch = 0 : i64, scratch_operands = 0 : i64, tpu.core_type = #tpu.core_type<tc>, window_params = [{transform_indices = @transform_0, window_bounds = array<i64: 70>}, {transform_indices = @transform_1, window_bounds = array<i64: 4, 8, 128>}, {transform_indices = @transform_2, window_bounds = array<i64: 2, 8, 128>}]} {
    %c0 = arith.constant 0 : index
    %c0_0 = arith.constant 0 : index
    %c0_1 = arith.constant 0 : index
    %0 = vector.load %arg2[%c0, %c0_0, %c0_1] : memref<4x8x128xf32, #tpu.memory_space<vmem>>, vector<1x8x128xf32>
    %1 = vector.shape_cast %0 : vector<1x8x128xf32> to vector<8x128xf32>
    %c1 = arith.constant 1 : index
    %c0_2 = arith.constant 0 : index
    %c0_3 = arith.constant 0 : index
    %2 = vector.load %arg2[%c1, %c0_2, %c0_3] : memref<4x8x128xf32, #tpu.memory_space<vmem>>, vector<1x8x128xf32>
    %3 = vector.shape_cast %2 : vector<1x8x128xf32> to vector<8x128xf32>
    %c2 = arith.constant 2 : index
    %c0_4 = arith.constant 0 : index
    %c0_5 = arith.constant 0 : index
    %4 = vector.load %arg2[%c2, %c0_4, %c0_5] : memref<4x8x128xf32, #tpu.memory_space<vmem>>, vector<1x8x128xf32>
    %5 = vector.shape_cast %4 : vector<1x8x128xf32> to vector<8x128xf32>
    %c3 = arith.constant 3 : index
    %c0_6 = arith.constant 0 : index
    %c0_7 = arith.constant 0 : index
    %6 = vector.load %arg2[%c3, %c0_6, %c0_7] : memref<4x8x128xf32, #tpu.memory_space<vmem>>, vector<1x8x128xf32>
    %7 = vector.shape_cast %6 : vector<1x8x128xf32> to vector<8x128xf32>
    %c0_8 = arith.constant 0 : index
    %8 = memref.load %arg1[%c0_8] : memref<70xf32, #tpu.memory_space<smem>>
    %9 = vector.broadcast %8 : f32 to vector<8x128xf32>
    %10 = arith.mulf %1, %9 : vector<8x128xf32>
    %c16 = arith.constant 16 : index
    %11 = memref.load %arg1[%c16] : memref<70xf32, #tpu.memory_space<smem>>
    %12 = vector.broadcast %11 : f32 to vector<8x128xf32>
    %13 = arith.addf %10, %12 : vector<8x128xf32>
    %c4 = arith.constant 4 : index
    %14 = memref.load %arg1[%c4] : memref<70xf32, #tpu.memory_space<smem>>
    %15 = vector.broadcast %14 : f32 to vector<8x128xf32>
    %16 = arith.mulf %3, %15 : vector<8x128xf32>
    %17 = arith.addf %13, %16 : vector<8x128xf32>
    %c8 = arith.constant 8 : index
    %18 = memref.load %arg1[%c8] : memref<70xf32, #tpu.memory_space<smem>>
    %19 = vector.broadcast %18 : f32 to vector<8x128xf32>
    %20 = arith.mulf %5, %19 : vector<8x128xf32>
    %21 = arith.addf %17, %20 : vector<8x128xf32>
    %c12 = arith.constant 12 : index
    %22 = memref.load %arg1[%c12] : memref<70xf32, #tpu.memory_space<smem>>
    %23 = vector.broadcast %22 : f32 to vector<8x128xf32>
    %24 = arith.mulf %7, %23 : vector<8x128xf32>
    %25 = arith.addf %21, %24 : vector<8x128xf32>
    %cst = arith.constant 0.000000e+00 : f32
    %26 = vector.broadcast %cst : f32 to vector<8x128xf32>
    %27 = arith.maximumf %25, %26 : vector<8x128xf32>
    %c1_9 = arith.constant 1 : index
    %28 = memref.load %arg1[%c1_9] : memref<70xf32, #tpu.memory_space<smem>>
    %29 = vector.broadcast %28 : f32 to vector<8x128xf32>
    %30 = arith.mulf %1, %29 : vector<8x128xf32>
    %c17 = arith.constant 17 : index
    %31 = memref.load %arg1[%c17] : memref<70xf32, #tpu.memory_space<smem>>
    %32 = vector.broadcast %31 : f32 to vector<8x128xf32>
    %33 = arith.addf %30, %32 : vector<8x128xf32>
    %c5 = arith.constant 5 : index
    %34 = memref.load %arg1[%c5] : memref<70xf32, #tpu.memory_space<smem>>
    %35 = vector.broadcast %34 : f32 to vector<8x128xf32>
    %36 = arith.mulf %3, %35 : vector<8x128xf32>
    %37 = arith.addf %33, %36 : vector<8x128xf32>
    %c9 = arith.constant 9 : index
    %38 = memref.load %arg1[%c9] : memref<70xf32, #tpu.memory_space<smem>>
    %39 = vector.broadcast %38 : f32 to vector<8x128xf32>
    %40 = arith.mulf %5, %39 : vector<8x128xf32>
    %41 = arith.addf %37, %40 : vector<8x128xf32>
    %c13 = arith.constant 13 : index
    %42 = memref.load %arg1[%c13] : memref<70xf32, #tpu.memory_space<smem>>
    %43 = vector.broadcast %42 : f32 to vector<8x128xf32>
    %44 = arith.mulf %7, %43 : vector<8x128xf32>
    %45 = arith.addf %41, %44 : vector<8x128xf32>
    %cst_10 = arith.constant 0.000000e+00 : f32
    %46 = vector.broadcast %cst_10 : f32 to vector<8x128xf32>
    %47 = arith.maximumf %45, %46 : vector<8x128xf32>
    %c2_11 = arith.constant 2 : index
    %48 = memref.load %arg1[%c2_11] : memref<70xf32, #tpu.memory_space<smem>>
    %49 = vector.broadcast %48 : f32 to vector<8x128xf32>
    %50 = arith.mulf %1, %49 : vector<8x128xf32>
    %c18 = arith.constant 18 : index
    %51 = memref.load %arg1[%c18] : memref<70xf32, #tpu.memory_space<smem>>
    %52 = vector.broadcast %51 : f32 to vector<8x128xf32>
    %53 = arith.addf %50, %52 : vector<8x128xf32>
    %c6 = arith.constant 6 : index
    %54 = memref.load %arg1[%c6] : memref<70xf32, #tpu.memory_space<smem>>
    %55 = vector.broadcast %54 : f32 to vector<8x128xf32>
    %56 = arith.mulf %3, %55 : vector<8x128xf32>
    %57 = arith.addf %53, %56 : vector<8x128xf32>
    %c10 = arith.constant 10 : index
    %58 = memref.load %arg1[%c10] : memref<70xf32, #tpu.memory_space<smem>>
    %59 = vector.broadcast %58 : f32 to vector<8x128xf32>
    %60 = arith.mulf %5, %59 : vector<8x128xf32>
    %61 = arith.addf %57, %60 : vector<8x128xf32>
    %c14 = arith.constant 14 : index
    %62 = memref.load %arg1[%c14] : memref<70xf32, #tpu.memory_space<smem>>
    %63 = vector.broadcast %62 : f32 to vector<8x128xf32>
    %64 = arith.mulf %7, %63 : vector<8x128xf32>
    %65 = arith.addf %61, %64 : vector<8x128xf32>
    %cst_12 = arith.constant 0.000000e+00 : f32
    %66 = vector.broadcast %cst_12 : f32 to vector<8x128xf32>
    %67 = arith.maximumf %65, %66 : vector<8x128xf32>
    %c3_13 = arith.constant 3 : index
    %68 = memref.load %arg1[%c3_13] : memref<70xf32, #tpu.memory_space<smem>>
    %69 = vector.broadcast %68 : f32 to vector<8x128xf32>
    %70 = arith.mulf %1, %69 : vector<8x128xf32>
    %c19 = arith.constant 19 : index
    %71 = memref.load %arg1[%c19] : memref<70xf32, #tpu.memory_space<smem>>
    %72 = vector.broadcast %71 : f32 to vector<8x128xf32>
    %73 = arith.addf %70, %72 : vector<8x128xf32>
    %c7 = arith.constant 7 : index
    %74 = memref.load %arg1[%c7] : memref<70xf32, #tpu.memory_space<smem>>
    %75 = vector.broadcast %74 : f32 to vector<8x128xf32>
    %76 = arith.mulf %3, %75 : vector<8x128xf32>
    %77 = arith.addf %73, %76 : vector<8x128xf32>
    %c11 = arith.constant 11 : index
    %78 = memref.load %arg1[%c11] : memref<70xf32, #tpu.memory_space<smem>>
    %79 = vector.broadcast %78 : f32 to vector<8x128xf32>
    %80 = arith.mulf %5, %79 : vector<8x128xf32>
    %81 = arith.addf %77, %80 : vector<8x128xf32>
    %c15 = arith.constant 15 : index
    %82 = memref.load %arg1[%c15] : memref<70xf32, #tpu.memory_space<smem>>
    %83 = vector.broadcast %82 : f32 to vector<8x128xf32>
    %84 = arith.mulf %7, %83 : vector<8x128xf32>
    %85 = arith.addf %81, %84 : vector<8x128xf32>
    %cst_14 = arith.constant 0.000000e+00 : f32
    %86 = vector.broadcast %cst_14 : f32 to vector<8x128xf32>
    %87 = arith.maximumf %85, %86 : vector<8x128xf32>
    %c20 = arith.constant 20 : index
    %88 = memref.load %arg1[%c20] : memref<70xf32, #tpu.memory_space<smem>>
    %89 = vector.broadcast %88 : f32 to vector<8x128xf32>
    %90 = arith.mulf %27, %89 : vector<8x128xf32>
    %c36 = arith.constant 36 : index
    %91 = memref.load %arg1[%c36] : memref<70xf32, #tpu.memory_space<smem>>
    %92 = vector.broadcast %91 : f32 to vector<8x128xf32>
    %93 = arith.addf %90, %92 : vector<8x128xf32>
    %c24 = arith.constant 24 : index
    %94 = memref.load %arg1[%c24] : memref<70xf32, #tpu.memory_space<smem>>
    %95 = vector.broadcast %94 : f32 to vector<8x128xf32>
    %96 = arith.mulf %47, %95 : vector<8x128xf32>
    %97 = arith.addf %93, %96 : vector<8x128xf32>
    %c28 = arith.constant 28 : index
    %98 = memref.load %arg1[%c28] : memref<70xf32, #tpu.memory_space<smem>>
    %99 = vector.broadcast %98 : f32 to vector<8x128xf32>
    %100 = arith.mulf %67, %99 : vector<8x128xf32>
    %101 = arith.addf %97, %100 : vector<8x128xf32>
    %c32 = arith.constant 32 : index
    %102 = memref.load %arg1[%c32] : memref<70xf32, #tpu.memory_space<smem>>
    %103 = vector.broadcast %102 : f32 to vector<8x128xf32>
    %104 = arith.mulf %87, %103 : vector<8x128xf32>
    %105 = arith.addf %101, %104 : vector<8x128xf32>
    %cst_15 = arith.constant 0.000000e+00 : f32
    %106 = vector.broadcast %cst_15 : f32 to vector<8x128xf32>
    %107 = arith.maximumf %105, %106 : vector<8x128xf32>
    %c21 = arith.constant 21 : index
    %108 = memref.load %arg1[%c21] : memref<70xf32, #tpu.memory_space<smem>>
    %109 = vector.broadcast %108 : f32 to vector<8x128xf32>
    %110 = arith.mulf %27, %109 : vector<8x128xf32>
    %c37 = arith.constant 37 : index
    %111 = memref.load %arg1[%c37] : memref<70xf32, #tpu.memory_space<smem>>
    %112 = vector.broadcast %111 : f32 to vector<8x128xf32>
    %113 = arith.addf %110, %112 : vector<8x128xf32>
    %c25 = arith.constant 25 : index
    %114 = memref.load %arg1[%c25] : memref<70xf32, #tpu.memory_space<smem>>
    %115 = vector.broadcast %114 : f32 to vector<8x128xf32>
    %116 = arith.mulf %47, %115 : vector<8x128xf32>
    %117 = arith.addf %113, %116 : vector<8x128xf32>
    %c29 = arith.constant 29 : index
    %118 = memref.load %arg1[%c29] : memref<70xf32, #tpu.memory_space<smem>>
    %119 = vector.broadcast %118 : f32 to vector<8x128xf32>
    %120 = arith.mulf %67, %119 : vector<8x128xf32>
    %121 = arith.addf %117, %120 : vector<8x128xf32>
    %c33 = arith.constant 33 : index
    %122 = memref.load %arg1[%c33] : memref<70xf32, #tpu.memory_space<smem>>
    %123 = vector.broadcast %122 : f32 to vector<8x128xf32>
    %124 = arith.mulf %87, %123 : vector<8x128xf32>
    %125 = arith.addf %121, %124 : vector<8x128xf32>
    %cst_16 = arith.constant 0.000000e+00 : f32
    %126 = vector.broadcast %cst_16 : f32 to vector<8x128xf32>
    %127 = arith.maximumf %125, %126 : vector<8x128xf32>
    %c22 = arith.constant 22 : index
    %128 = memref.load %arg1[%c22] : memref<70xf32, #tpu.memory_space<smem>>
    %129 = vector.broadcast %128 : f32 to vector<8x128xf32>
    %130 = arith.mulf %27, %129 : vector<8x128xf32>
    %c38 = arith.constant 38 : index
    %131 = memref.load %arg1[%c38] : memref<70xf32, #tpu.memory_space<smem>>
    %132 = vector.broadcast %131 : f32 to vector<8x128xf32>
    %133 = arith.addf %130, %132 : vector<8x128xf32>
    %c26 = arith.constant 26 : index
    %134 = memref.load %arg1[%c26] : memref<70xf32, #tpu.memory_space<smem>>
    %135 = vector.broadcast %134 : f32 to vector<8x128xf32>
    %136 = arith.mulf %47, %135 : vector<8x128xf32>
    %137 = arith.addf %133, %136 : vector<8x128xf32>
    %c30 = arith.constant 30 : index
    %138 = memref.load %arg1[%c30] : memref<70xf32, #tpu.memory_space<smem>>
    %139 = vector.broadcast %138 : f32 to vector<8x128xf32>
    %140 = arith.mulf %67, %139 : vector<8x128xf32>
    %141 = arith.addf %137, %140 : vector<8x128xf32>
    %c34 = arith.constant 34 : index
    %142 = memref.load %arg1[%c34] : memref<70xf32, #tpu.memory_space<smem>>
    %143 = vector.broadcast %142 : f32 to vector<8x128xf32>
    %144 = arith.mulf %87, %143 : vector<8x128xf32>
    %145 = arith.addf %141, %144 : vector<8x128xf32>
    %cst_17 = arith.constant 0.000000e+00 : f32
    %146 = vector.broadcast %cst_17 : f32 to vector<8x128xf32>
    %147 = arith.maximumf %145, %146 : vector<8x128xf32>
    %c23 = arith.constant 23 : index
    %148 = memref.load %arg1[%c23] : memref<70xf32, #tpu.memory_space<smem>>
    %149 = vector.broadcast %148 : f32 to vector<8x128xf32>
    %150 = arith.mulf %27, %149 : vector<8x128xf32>
    %c39 = arith.constant 39 : index
    %151 = memref.load %arg1[%c39] : memref<70xf32, #tpu.memory_space<smem>>
    %152 = vector.broadcast %151 : f32 to vector<8x128xf32>
    %153 = arith.addf %150, %152 : vector<8x128xf32>
    %c27 = arith.constant 27 : index
    %154 = memref.load %arg1[%c27] : memref<70xf32, #tpu.memory_space<smem>>
    %155 = vector.broadcast %154 : f32 to vector<8x128xf32>
    %156 = arith.mulf %47, %155 : vector<8x128xf32>
    %157 = arith.addf %153, %156 : vector<8x128xf32>
    %c31 = arith.constant 31 : index
    %158 = memref.load %arg1[%c31] : memref<70xf32, #tpu.memory_space<smem>>
    %159 = vector.broadcast %158 : f32 to vector<8x128xf32>
    %160 = arith.mulf %67, %159 : vector<8x128xf32>
    %161 = arith.addf %157, %160 : vector<8x128xf32>
    %c35 = arith.constant 35 : index
    %162 = memref.load %arg1[%c35] : memref<70xf32, #tpu.memory_space<smem>>
    %163 = vector.broadcast %162 : f32 to vector<8x128xf32>
    %164 = arith.mulf %87, %163 : vector<8x128xf32>
    %165 = arith.addf %161, %164 : vector<8x128xf32>
    %cst_18 = arith.constant 0.000000e+00 : f32
    %166 = vector.broadcast %cst_18 : f32 to vector<8x128xf32>
    %167 = arith.maximumf %165, %166 : vector<8x128xf32>
    %c40 = arith.constant 40 : index
    %168 = memref.load %arg1[%c40] : memref<70xf32, #tpu.memory_space<smem>>
    %169 = vector.broadcast %168 : f32 to vector<8x128xf32>
    %170 = arith.mulf %107, %169 : vector<8x128xf32>
    %c56 = arith.constant 56 : index
    %171 = memref.load %arg1[%c56] : memref<70xf32, #tpu.memory_space<smem>>
    %172 = vector.broadcast %171 : f32 to vector<8x128xf32>
    %173 = arith.addf %170, %172 : vector<8x128xf32>
    %c44 = arith.constant 44 : index
    %174 = memref.load %arg1[%c44] : memref<70xf32, #tpu.memory_space<smem>>
    %175 = vector.broadcast %174 : f32 to vector<8x128xf32>
    %176 = arith.mulf %127, %175 : vector<8x128xf32>
    %177 = arith.addf %173, %176 : vector<8x128xf32>
    %c48 = arith.constant 48 : index
    %178 = memref.load %arg1[%c48] : memref<70xf32, #tpu.memory_space<smem>>
    %179 = vector.broadcast %178 : f32 to vector<8x128xf32>
    %180 = arith.mulf %147, %179 : vector<8x128xf32>
    %181 = arith.addf %177, %180 : vector<8x128xf32>
    %c52 = arith.constant 52 : index
    %182 = memref.load %arg1[%c52] : memref<70xf32, #tpu.memory_space<smem>>
    %183 = vector.broadcast %182 : f32 to vector<8x128xf32>
    %184 = arith.mulf %167, %183 : vector<8x128xf32>
    %185 = arith.addf %181, %184 : vector<8x128xf32>
    %cst_19 = arith.constant 0.000000e+00 : f32
    %186 = vector.broadcast %cst_19 : f32 to vector<8x128xf32>
    %187 = arith.maximumf %185, %186 : vector<8x128xf32>
    %c41 = arith.constant 41 : index
    %188 = memref.load %arg1[%c41] : memref<70xf32, #tpu.memory_space<smem>>
    %189 = vector.broadcast %188 : f32 to vector<8x128xf32>
    %190 = arith.mulf %107, %189 : vector<8x128xf32>
    %c57 = arith.constant 57 : index
    %191 = memref.load %arg1[%c57] : memref<70xf32, #tpu.memory_space<smem>>
    %192 = vector.broadcast %191 : f32 to vector<8x128xf32>
    %193 = arith.addf %190, %192 : vector<8x128xf32>
    %c45 = arith.constant 45 : index
    %194 = memref.load %arg1[%c45] : memref<70xf32, #tpu.memory_space<smem>>
    %195 = vector.broadcast %194 : f32 to vector<8x128xf32>
    %196 = arith.mulf %127, %195 : vector<8x128xf32>
    %197 = arith.addf %193, %196 : vector<8x128xf32>
    %c49 = arith.constant 49 : index
    %198 = memref.load %arg1[%c49] : memref<70xf32, #tpu.memory_space<smem>>
    %199 = vector.broadcast %198 : f32 to vector<8x128xf32>
    %200 = arith.mulf %147, %199 : vector<8x128xf32>
    %201 = arith.addf %197, %200 : vector<8x128xf32>
    %c53 = arith.constant 53 : index
    %202 = memref.load %arg1[%c53] : memref<70xf32, #tpu.memory_space<smem>>
    %203 = vector.broadcast %202 : f32 to vector<8x128xf32>
    %204 = arith.mulf %167, %203 : vector<8x128xf32>
    %205 = arith.addf %201, %204 : vector<8x128xf32>
    %cst_20 = arith.constant 0.000000e+00 : f32
    %206 = vector.broadcast %cst_20 : f32 to vector<8x128xf32>
    %207 = arith.maximumf %205, %206 : vector<8x128xf32>
    %c42 = arith.constant 42 : index
    %208 = memref.load %arg1[%c42] : memref<70xf32, #tpu.memory_space<smem>>
    %209 = vector.broadcast %208 : f32 to vector<8x128xf32>
    %210 = arith.mulf %107, %209 : vector<8x128xf32>
    %c58 = arith.constant 58 : index
    %211 = memref.load %arg1[%c58] : memref<70xf32, #tpu.memory_space<smem>>
    %212 = vector.broadcast %211 : f32 to vector<8x128xf32>
    %213 = arith.addf %210, %212 : vector<8x128xf32>
    %c46 = arith.constant 46 : index
    %214 = memref.load %arg1[%c46] : memref<70xf32, #tpu.memory_space<smem>>
    %215 = vector.broadcast %214 : f32 to vector<8x128xf32>
    %216 = arith.mulf %127, %215 : vector<8x128xf32>
    %217 = arith.addf %213, %216 : vector<8x128xf32>
    %c50 = arith.constant 50 : index
    %218 = memref.load %arg1[%c50] : memref<70xf32, #tpu.memory_space<smem>>
    %219 = vector.broadcast %218 : f32 to vector<8x128xf32>
    %220 = arith.mulf %147, %219 : vector<8x128xf32>
    %221 = arith.addf %217, %220 : vector<8x128xf32>
    %c54 = arith.constant 54 : index
    %222 = memref.load %arg1[%c54] : memref<70xf32, #tpu.memory_space<smem>>
    %223 = vector.broadcast %222 : f32 to vector<8x128xf32>
    %224 = arith.mulf %167, %223 : vector<8x128xf32>
    %225 = arith.addf %221, %224 : vector<8x128xf32>
    %cst_21 = arith.constant 0.000000e+00 : f32
    %226 = vector.broadcast %cst_21 : f32 to vector<8x128xf32>
    %227 = arith.maximumf %225, %226 : vector<8x128xf32>
    %c43 = arith.constant 43 : index
    %228 = memref.load %arg1[%c43] : memref<70xf32, #tpu.memory_space<smem>>
    %229 = vector.broadcast %228 : f32 to vector<8x128xf32>
    %230 = arith.mulf %107, %229 : vector<8x128xf32>
    %c59 = arith.constant 59 : index
    %231 = memref.load %arg1[%c59] : memref<70xf32, #tpu.memory_space<smem>>
    %232 = vector.broadcast %231 : f32 to vector<8x128xf32>
    %233 = arith.addf %230, %232 : vector<8x128xf32>
    %c47 = arith.constant 47 : index
    %234 = memref.load %arg1[%c47] : memref<70xf32, #tpu.memory_space<smem>>
    %235 = vector.broadcast %234 : f32 to vector<8x128xf32>
    %236 = arith.mulf %127, %235 : vector<8x128xf32>
    %237 = arith.addf %233, %236 : vector<8x128xf32>
    %c51 = arith.constant 51 : index
    %238 = memref.load %arg1[%c51] : memref<70xf32, #tpu.memory_space<smem>>
    %239 = vector.broadcast %238 : f32 to vector<8x128xf32>
    %240 = arith.mulf %147, %239 : vector<8x128xf32>
    %241 = arith.addf %237, %240 : vector<8x128xf32>
    %c55 = arith.constant 55 : index
    %242 = memref.load %arg1[%c55] : memref<70xf32, #tpu.memory_space<smem>>
    %243 = vector.broadcast %242 : f32 to vector<8x128xf32>
    %244 = arith.mulf %167, %243 : vector<8x128xf32>
    %245 = arith.addf %241, %244 : vector<8x128xf32>
    %cst_22 = arith.constant 0.000000e+00 : f32
    %246 = vector.broadcast %cst_22 : f32 to vector<8x128xf32>
    %247 = arith.maximumf %245, %246 : vector<8x128xf32>
    %c60 = arith.constant 60 : index
    %248 = memref.load %arg1[%c60] : memref<70xf32, #tpu.memory_space<smem>>
    %249 = vector.broadcast %248 : f32 to vector<8x128xf32>
    %250 = arith.mulf %187, %249 : vector<8x128xf32>
    %c68 = arith.constant 68 : index
    %251 = memref.load %arg1[%c68] : memref<70xf32, #tpu.memory_space<smem>>
    %252 = vector.broadcast %251 : f32 to vector<8x128xf32>
    %253 = arith.addf %250, %252 : vector<8x128xf32>
    %c62 = arith.constant 62 : index
    %254 = memref.load %arg1[%c62] : memref<70xf32, #tpu.memory_space<smem>>
    %255 = vector.broadcast %254 : f32 to vector<8x128xf32>
    %256 = arith.mulf %207, %255 : vector<8x128xf32>
    %257 = arith.addf %253, %256 : vector<8x128xf32>
    %c64 = arith.constant 64 : index
    %258 = memref.load %arg1[%c64] : memref<70xf32, #tpu.memory_space<smem>>
    %259 = vector.broadcast %258 : f32 to vector<8x128xf32>
    %260 = arith.mulf %227, %259 : vector<8x128xf32>
    %261 = arith.addf %257, %260 : vector<8x128xf32>
    %c66 = arith.constant 66 : index
    %262 = memref.load %arg1[%c66] : memref<70xf32, #tpu.memory_space<smem>>
    %263 = vector.broadcast %262 : f32 to vector<8x128xf32>
    %264 = arith.mulf %247, %263 : vector<8x128xf32>
    %265 = arith.addf %261, %264 : vector<8x128xf32>
    %c61 = arith.constant 61 : index
    %266 = memref.load %arg1[%c61] : memref<70xf32, #tpu.memory_space<smem>>
    %267 = vector.broadcast %266 : f32 to vector<8x128xf32>
    %268 = arith.mulf %187, %267 : vector<8x128xf32>
    %c69 = arith.constant 69 : index
    %269 = memref.load %arg1[%c69] : memref<70xf32, #tpu.memory_space<smem>>
    %270 = vector.broadcast %269 : f32 to vector<8x128xf32>
    %271 = arith.addf %268, %270 : vector<8x128xf32>
    %c63 = arith.constant 63 : index
    %272 = memref.load %arg1[%c63] : memref<70xf32, #tpu.memory_space<smem>>
    %273 = vector.broadcast %272 : f32 to vector<8x128xf32>
    %274 = arith.mulf %207, %273 : vector<8x128xf32>
    %275 = arith.addf %271, %274 : vector<8x128xf32>
    %c65 = arith.constant 65 : index
    %276 = memref.load %arg1[%c65] : memref<70xf32, #tpu.memory_space<smem>>
    %277 = vector.broadcast %276 : f32 to vector<8x128xf32>
    %278 = arith.mulf %227, %277 : vector<8x128xf32>
    %279 = arith.addf %275, %278 : vector<8x128xf32>
    %c67 = arith.constant 67 : index
    %280 = memref.load %arg1[%c67] : memref<70xf32, #tpu.memory_space<smem>>
    %281 = vector.broadcast %280 : f32 to vector<8x128xf32>
    %282 = arith.mulf %247, %281 : vector<8x128xf32>
    %283 = arith.addf %279, %282 : vector<8x128xf32>
    %c0_23 = arith.constant 0 : index
    %c0_24 = arith.constant 0 : index
    %c0_25 = arith.constant 0 : index
    %284 = vector.load %arg3[%c0_23, %c0_24, %c0_25] : memref<2x8x128xf32, #tpu.memory_space<vmem>>, vector<1x8x128xf32>
    %285 = vector.shape_cast %284 : vector<1x8x128xf32> to vector<8x128xf32>
    %286 = vector.shape_cast %265 : vector<8x128xf32> to vector<1x8x128xf32>
    tpu.vector_store %arg3[%c0_23, %c0_24, %c0_25], %286 {strides = array<i32>} : memref<2x8x128xf32, #tpu.memory_space<vmem>>, vector<1x8x128xf32>,
    %c1_26 = arith.constant 1 : index
    %c0_27 = arith.constant 0 : index
    %c0_28 = arith.constant 0 : index
    %287 = vector.load %arg3[%c1_26, %c0_27, %c0_28] : memref<2x8x128xf32, #tpu.memory_space<vmem>>, vector<1x8x128xf32>
    %288 = vector.shape_cast %287 : vector<1x8x128xf32> to vector<8x128xf32>
    %289 = vector.shape_cast %283 : vector<8x128xf32> to vector<1x8x128xf32>
    tpu.vector_store %arg3[%c1_26, %c0_27, %c0_28], %289 {strides = array<i32>} : memref<2x8x128xf32, #tpu.memory_space<vmem>>, vector<1x8x128xf32>,
    return
  }
  func.func @transform_0(%arg0: i32) -> i32 {
    %c0_i32 = arith.constant 0 : i32
    %c0_i32_0 = arith.constant 0 : i32
    return %c0_i32 : i32
  }
  func.func @transform_1(%arg0: i32) -> (i32, i32, i32) {
    %c0_i32 = arith.constant 0 : i32
    %c0_i32_0 = arith.constant 0 : i32
    %c0_i32_1 = arith.constant 0 : i32
    return %c0_i32, %arg0, %c0_i32_0 : i32, i32, i32
  }
  func.func @transform_2(%arg0: i32) -> (i32, i32, i32) {
    %c0_i32 = arith.constant 0 : i32
    %c0_i32_0 = arith.constant 0 : i32
    %c0_i32_1 = arith.constant 0 : i32
    return %c0_i32, %arg0, %c0_i32_0 : i32, i32, i32
  }
}

</mosaic_0001>

<bundles_post_ra>
// kernel: tpu_custom_call.1
= control target key start
LH: loop header
LB: loop body
LE: loop exit
PB: predicated region body
PF: predicated region fallthrough
CT: control target
= control target key end

     0   :  { %7 = vsyncpa [#allocation5], 0  ;;  %s570_s0 = inlined_call_operand.hbm [shape: f32[70], index: 0, kind: input, shape index: {}]   ;;  %s571_s1 = inlined_call_operand.hbm [shape: f32[4,8,128], index: 1, kind: input, shape index: {}]   ;;  %s572_s2 = inlined_call_operand.hbm [shape: f32[2,8,128], index: 2, kind: output, shape index: {}]  }
   0x1   :  { %8 = vsyncpa [#allocation3], 0 }
   0x2   :  { %9 = vsyncpa [#allocation4], 0  ;;  %s15_s11 = sshll.u32 %s570_s0, 4  ;;  %s23_s14 = sshll.u32 %s571_s1, 4  ;;  %s16_s11 = int_to_ptr.hbm [resolvable:$true] %s15_s11  ;;  %s24_s14 = int_to_ptr.hbm [resolvable:$true] %s23_s14 }
   0x3   :  { %s475_s15 = smov [#allocation2]   ;;  %s476_s16 = smov [#allocation6]  }
   0x4   :  { %18 = dma.hbm_to_smem %s16_s11, 16, %s475_s15, [#allocation5]  }
   0x5   :  { %s25_s17 = sshll.u32 %s476_s16, 4  ;;  %s477_s18 = smov 128   ;;  %s26_s17 = int_to_ptr.vmem [resolvable:$true] %s25_s17 }
   0x6   :  { %s478_s19 = smov 8  }
   0x7   :  { %31 = dma.hbm_to_vmem [thread:$0]  %s24_s14, 512, %s26_s17, [#allocation3], %s477_s18, %s477_s18, %s478_s19  }
   0x8   :  { %469 = dma.done.wait [#allocation5], 16  }
   0x9   :  { %470 = vsyncadd [#allocation5], 4294967280 }
   0xa   :  { %471 = dma.done.wait [#allocation3], 512  }
   0xb   :  { %472 = vsyncadd [#allocation3], 4294966784 }
   0xc   :  { %40 = sfence }
   0xd   :  { %s48_s0 = sld [smem:[#allocation2]]  ;;  %v41_v0 = vld [vmem:[#allocation6] sm:$0xff]  ;;  %v506_v1 = vld [vmem:[#allocation6 + $0x8] sm:$0xff]  ;;  %v508_v5 = vld [vmem:[#allocation6 + $0x10] sm:$0xff] }
   0xe   :  { %s335_s20 = sld [smem:[#allocation2 + $0x10]]  ;;  %v47_v13 = vld [vmem:[#allocation6 + $0x18] sm:$0xff] }
   0xf   :  { %s336_s1 = sld [smem:[#allocation2 + $0x4]] }
  0x10   :  { %s337_s21 = sld [smem:[#allocation2 + $0x8]] }
  0x11   :  { %s504_s22 = sld [smem:[#allocation2 + $0xc]] }
  0x12   :  { %s339_s23 = sld [smem:[#allocation2 + $0x1]] }
  0x13   :  { %v49_v2 = vstv %s48_s0  ;;  %s340_s24 = sld [smem:[#allocation2 + $0x11]] }
  0x14   :  { %v50_v3 = vmul.f32 %v49_v2, %v41_v0  ;;  %v52_v4 = vstv %s335_s20  ;;  %s341_s25 = sld [smem:[#allocation2 + $0x5]] }
  0x15   :  { %v55_v6 = vstv %s336_s1  ;;  %s342_s26 = sld [smem:[#allocation2 + $0x9]] }
  0x16   :  { %v53_v7 = vadd.f32 %v52_v4, %v50_v3  ;;  %v56_v8 = vmul.f32 %v55_v6, %v506_v1  ;;  %v59_v9 = vstv %s337_s21  ;;  %s343_s27 = sld [smem:[#allocation2 + $0xd]] }
  0x17   :  { %s344_s28 = sld [smem:[#allocation2 + $0x2]]  ;;  %v60_v11 = vmul.f32 %v59_v9, %v508_v5  ;;  %v63_v14 = vstv %s504_s22 }
  0x18   :  { %v57_v10 = vadd.f32 %v56_v8, %v53_v7  ;;  %v68_v12 = vstv %s339_s23  ;;  %s345_s29 = sld [smem:[#allocation2 + $0x12]]  ;;  %v64_v22 = vmul.f32 %v63_v14, %v47_v13 }
  0x19   :  { %v69_v15 = vmul.f32 %v68_v12, %v41_v0  ;;  %v71_v16 = vstv %s340_s24  ;;  %s346_s30 = sld [smem:[#allocation2 + $0x6]] }
  0x1a   :  { %v74_v17 = vstv %s341_s25  ;;  %s347_s3 = sld [smem:[#allocation2 + $0xa]]  ;;  %v61_v21 = vadd.f32 %v60_v11, %v57_v10 }
  0x1b   :  { %v72_v18 = vadd.f32 %v71_v16, %v69_v15  ;;  %v75_v19 = vmul.f32 %v74_v17, %v506_v1  ;;  %v78_v20 = vstv %s342_s26  ;;  %s348_s4 = sld [smem:[#allocation2 + $0xe]] }
  0x1c   :  { %v79_v23 = vmul.f32 %v78_v20, %v508_v5  ;;  %v82_v24 = vstv %s343_s27  ;;  %s349_s5 = sld [smem:[#allocation2 + $0x3]]  ;;  %v65_v32 = vadd.f32 %v64_v22, %v61_v21 }
  0x1d   :  { %v76_v25 = vadd.f32 %v75_v19, %v72_v18  ;;  %v87_v26 = vstv %s344_s28  ;;  %s350_s6 = sld [smem:[#allocation2 + $0x13]]  ;;  %v83_v27 = vmul.f32 %v82_v24, %v47_v13 }
  0x1e   :  { %v88_v28 = vmul.f32 %v87_v26, %v41_v0  ;;  %v90_v29 = vstv %s345_s29  ;;  %s351_s7 = sld [smem:[#allocation2 + $0x7]]  ;;  %v517_v44 = vmax.f32 %v65_v32, 0.0 }
  0x1f   :  { %v80_v30 = vadd.f32 %v79_v23, %v76_v25  ;;  %v93_v31 = vstv %s346_s30  ;;  %s352_s8 = sld [smem:[#allocation2 + $0xb]] }
  0x20   :  { %v91_v33 = vadd.f32 %v90_v29, %v88_v28  ;;  %v94_v34 = vmul.f32 %v93_v31, %v506_v1  ;;  %v97_v35 = vstv %s347_s3  ;;  %s353_s9 = sld [smem:[#allocation2 + $0xf]] }
  0x21   :  { %v98_v36 = vmul.f32 %v97_v35, %v508_v5  ;;  %v101_v37 = vstv %s348_s4  ;;  %s354_s10 = sld [smem:[#allocation2 + $0x14]]  ;;  %v84_v38 = vadd.f32 %v83_v27, %v80_v30 }
  0x22   :  { %v95_v39 = vadd.f32 %v94_v34, %v91_v33  ;;  %v102_v40 = vmul.f32 %v101_v37, %v47_v13  ;;  %v106_v41 = vstv %s349_s5  ;;  %s355_s11 = sld [smem:[#allocation2 + $0x24]] }
  0x23   :  { %v107_v42 = vmul.f32 %v106_v41, %v41_v0  ;;  %v109_v43 = vstv %s350_s6  ;;  %s356_s12 = sld [smem:[#allocation2 + $0x18]]  ;;  %v522_v50 = vmax.f32 %v84_v38, 0.0 }
  0x24   :  { %v99_v45 = vadd.f32 %v98_v36, %v95_v39  ;;  %v112_v46 = vstv %s351_s7  ;;  %s357_s13 = sld [smem:[#allocation2 + $0x1c]] }
  0x25   :  { %v110_v47 = vadd.f32 %v109_v43, %v107_v42  ;;  %v113_v48 = vmul.f32 %v112_v46, %v506_v1  ;;  %v116_v49 = vstv %s352_s8  ;;  %s520_s14 = sld [smem:[#allocation2 + $0x20]] }
  0x26   :  { %v103_v51 = vadd.f32 %v102_v40, %v99_v45  ;;  %v117_v52 = vmul.f32 %v116_v49, %v508_v5  ;;  %v120_v53 = vstv %s353_s9  ;;  %s359_s15 = sld [smem:[#allocation2 + $0x15]] }
  0x27   :  { %v114_v54 = vadd.f32 %v113_v48, %v110_v47  ;;  %v121_v55 = vmul.f32 %v120_v53, %v47_v13  ;;  %v125_v56 = vstv %s354_s10  ;;  %s360_s16 = sld [smem:[#allocation2 + $0x25]] }
  0x28   :  { %v525_v57 = vmax.f32 %v103_v51, 0.0  ;;  %v126_v58 = vmul.f32 %v125_v56, %v517_v44  ;;  %v128_v59 = vstv %s355_s11  ;;  %s361_s17 = sld [smem:[#allocation2 + $0x19]] }
  0x29   :  { %v118_v60 = vadd.f32 %v117_v52, %v114_v54  ;;  %v131_v61 = vstv %s356_s12  ;;  %s362_s0 = sld [smem:[#allocation2 + $0x1d]] }
  0x2a   :  { %v129_v62 = vadd.f32 %v128_v59, %v126_v58  ;;  %v132_v63 = vmul.f32 %v131_v61, %v522_v50  ;;  %v135_v0 = vstv %s357_s13  ;;  %s363_s20 = sld [smem:[#allocation2 + $0x21]] }
  0x2b   :  { %v122_v1 = vadd.f32 %v121_v55, %v118_v60  ;;  %s364_s1 = sld [smem:[#allocation2 + $0x16]]  ;;  %v136_v3 = vmul.f32 %v135_v0, %v525_v57  ;;  %v139_v6 = vstv %s520_s14 }
  0x2c   :  { %v133_v2 = vadd.f32 %v132_v63, %v129_v62  ;;  %v144_v4 = vstv %s359_s15  ;;  %s365_s21 = sld [smem:[#allocation2 + $0x26]] }
  0x2d   :  { %v123_v5 = vmax.f32 %v122_v1, 0.0  ;;  %v145_v7 = vmul.f32 %v144_v4, %v517_v44  ;;  %v147_v8 = vstv %s360_s16  ;;  %s366_s22 = sld [smem:[#allocation2 + $0x1a]] }
  0x2e   :  { %v150_v9 = vstv %s361_s17  ;;  %s367_s23 = sld [smem:[#allocation2 + $0x1e]]  ;;  %v137_v13 = vadd.f32 %v136_v3, %v133_v2 }
  0x2f   :  { %v148_v10 = vadd.f32 %v147_v8, %v145_v7  ;;  %v151_v11 = vmul.f32 %v150_v9, %v522_v50  ;;  %v154_v12 = vstv %s362_s0  ;;  %s368_s24 = sld [smem:[#allocation2 + $0x22]]  ;;  %v140_v14 = vmul.f32 %v139_v6, %v123_v5 }
  0x30   :  { %v155_v15 = vmul.f32 %v154_v12, %v525_v57  ;;  %v158_v16 = vstv %s363_s20  ;;  %s369_s25 = sld [smem:[#allocation2 + $0x17]] }
  0x31   :  { %v152_v17 = vadd.f32 %v151_v11, %v148_v10  ;;  %v163_v18 = vstv %s364_s1  ;;  %s370_s26 = sld [smem:[#allocation2 + $0x27]]  ;;  %v159_v19 = vmul.f32 %v158_v16, %v123_v5  ;;  %v141_v24 = vadd.f32 %v140_v14, %v137_v13 }
  0x32   :  { %v164_v20 = vmul.f32 %v163_v18, %v517_v44  ;;  %v166_v21 = vstv %s365_s21  ;;  %s371_s27 = sld [smem:[#allocation2 + $0x1b]] }
  0x33   :  { %v156_v22 = vadd.f32 %v155_v15, %v152_v17  ;;  %v169_v23 = vstv %s366_s22  ;;  %s372_s28 = sld [smem:[#allocation2 + $0x1f]]  ;;  %v538_v36 = vmax.f32 %v141_v24, 0.0 }
  0x34   :  { %v167_v25 = vadd.f32 %v166_v21, %v164_v20  ;;  %v170_v26 = vmul.f32 %v169_v23, %v522_v50  ;;  %v173_v27 = vstv %s367_s23  ;;  %s373_s29 = sld [smem:[#allocation2 + $0x23]] }
  0x35   :  { %v174_v28 = vmul.f32 %v173_v27, %v525_v57  ;;  %v177_v29 = vstv %s368_s24  ;;  %s374_s30 = sld [smem:[#allocation2 + $0x28]]  ;;  %v160_v30 = vadd.f32 %v159_v19, %v156_v22 }
  0x36   :  { %v171_v31 = vadd.f32 %v170_v26, %v167_v25  ;;  %v178_v32 = vmul.f32 %v177_v29, %v123_v5  ;;  %v182_v33 = vstv %s369_s25  ;;  %s375_s3 = sld [smem:[#allocation2 + $0x38]] }
  0x37   :  { %v183_v34 = vmul.f32 %v182_v33, %v517_v44  ;;  %v185_v35 = vstv %s370_s26  ;;  %s376_s4 = sld [smem:[#allocation2 + $0x2c]]  ;;  %v543_v42 = vmax.f32 %v160_v30, 0.0 }
  0x38   :  { %v175_v37 = vadd.f32 %v174_v28, %v171_v31  ;;  %v188_v38 = vstv %s371_s27  ;;  %s377_s5 = sld [smem:[#allocation2 + $0x30]] }
  0x39   :  { %v186_v39 = vadd.f32 %v185_v35, %v183_v34  ;;  %v189_v40 = vmul.f32 %v188_v38, %v522_v50  ;;  %v192_v41 = vstv %s372_s28  ;;  %s541_s6 = sld [smem:[#allocation2 + $0x34]] }
  0x3a   :  { %v179_v43 = vadd.f32 %v178_v32, %v175_v37  ;;  %v193_v45 = vmul.f32 %v192_v41, %v525_v57  ;;  %v196_v46 = vstv %s373_s29  ;;  %s379_s7 = sld [smem:[#allocation2 + $0x29]] }
  0x3b   :  { %v190_v44 = vadd.f32 %v189_v40, %v186_v39  ;;  %v197_v47 = vmul.f32 %v196_v46, %v123_v5  ;;  %v201_v48 = vstv %s374_s30  ;;  %s380_s8 = sld [smem:[#allocation2 + $0x39]] }
  0x3c   :  { %v546_v49 = vmax.f32 %v179_v43, 0.0  ;;  %v202_v51 = vmul.f32 %v201_v48, %v538_v36  ;;  %v204_v52 = vstv %s375_s3  ;;  %s381_s9 = sld [smem:[#allocation2 + $0x2d]] }
  0x3d   :  { %v194_v50 = vadd.f32 %v193_v45, %v190_v44  ;;  %v207_v53 = vstv %s376_s4  ;;  %s382_s10 = sld [smem:[#allocation2 + $0x31]]  ;;  %s479_s4 = smov [#allocation7]  }
  0x3e   :  { %v205_v54 = vadd.f32 %v204_v52, %v202_v51  ;;  %v208_v55 = vmul.f32 %v207_v53, %v543_v42  ;;  %v211_v56 = vstv %s377_s5  ;;  %s383_s11 = sld [smem:[#allocation2 + $0x35]]  ;;  %s319_s5 = sshll.u32 %s479_s4, 4  ;;  %s320_s5 = int_to_ptr.vmem [resolvable:$true] %s319_s5 }
  0x3f   :  { %v198_v57 = vadd.f32 %v197_v47, %v194_v50  ;;  %s384_s12 = sld [smem:[#allocation2 + $0x2a]]  ;;  %v212_v59 = vmul.f32 %v211_v56, %v546_v49  ;;  %v215_v62 = vstv %s541_s6 }
  0x40   :  { %v209_v58 = vadd.f32 %v208_v55, %v205_v54  ;;  %v220_v60 = vstv %s379_s7  ;;  %s385_s13 = sld [smem:[#allocation2 + $0x3a]] }
  0x41   :  { %v199_v61 = vmax.f32 %v198_v57, 0.0  ;;  %v221_v63 = vmul.f32 %v220_v60, %v538_v36  ;;  %v223_v0 = vstv %s380_s8  ;;  %s386_s14 = sld [smem:[#allocation2 + $0x2e]]  ;;  %s321_s8 = sshll.u32 %s572_s2, 4  ;;  %s322_s8 = int_to_ptr.hbm [resolvable:$true] %s321_s8 }
  0x42   :  { %v226_v1 = vstv %s381_s9  ;;  %s387_s15 = sld [smem:[#allocation2 + $0x32]]  ;;  %v213_v5 = vadd.f32 %v212_v59, %v209_v58 }
  0x43   :  { %v224_v2 = vadd.f32 %v223_v0, %v221_v63  ;;  %v227_v3 = vmul.f32 %v226_v1, %v543_v42  ;;  %v230_v4 = vstv %s382_s10  ;;  %s388_s16 = sld [smem:[#allocation2 + $0x36]]  ;;  %v216_v6 = vmul.f32 %v215_v62, %v199_v61 }
  0x44   :  { %v231_v7 = vmul.f32 %v230_v4, %v546_v49  ;;  %v234_v8 = vstv %s383_s11  ;;  %s389_s17 = sld [smem:[#allocation2 + $0x2b]] }
  0x45   :  { %v228_v9 = vadd.f32 %v227_v3, %v224_v2  ;;  %v239_v10 = vstv %s384_s12  ;;  %s390_s0 = sld [smem:[#allocation2 + $0x3b]]  ;;  %v235_v11 = vmul.f32 %v234_v8, %v199_v61  ;;  %v217_v16 = vadd.f32 %v216_v6, %v213_v5 }
  0x46   :  { %v240_v12 = vmul.f32 %v239_v10, %v538_v36  ;;  %v242_v13 = vstv %s385_s13  ;;  %s391_s20 = sld [smem:[#allocation2 + $0x2f]] }
  0x47   :  { %v232_v14 = vadd.f32 %v231_v7, %v228_v9  ;;  %v245_v15 = vstv %s386_s14  ;;  %s392_s1 = sld [smem:[#allocation2 + $0x33]]  ;;  %v218_v28 = vmax.f32 %v217_v16, 0.0 }
  0x48   :  { %v243_v17 = vadd.f32 %v242_v13, %v240_v12  ;;  %v246_v18 = vmul.f32 %v245_v15, %v543_v42  ;;  %v249_v19 = vstv %s387_s15  ;;  %s393_s21 = sld [smem:[#allocation2 + $0x37]] }
  0x49   :  { %v250_v20 = vmul.f32 %v249_v19, %v546_v49  ;;  %v253_v21 = vstv %s388_s16  ;;  %s394_s22 = sld [smem:[#allocation2 + $0x3c]]  ;;  %v236_v22 = vadd.f32 %v235_v11, %v232_v14 }
  0x4a   :  { %v247_v23 = vadd.f32 %v246_v18, %v243_v17  ;;  %v254_v24 = vmul.f32 %v253_v21, %v199_v61  ;;  %v258_v25 = vstv %s389_s17  ;;  %s395_s23 = sld [smem:[#allocation2 + $0x44]] }
  0x4b   :  { %v259_v26 = vmul.f32 %v258_v25, %v538_v36  ;;  %v261_v27 = vstv %s390_s0  ;;  %s396_s24 = sld [smem:[#allocation2 + $0x3e]]  ;;  %v237_v34 = vmax.f32 %v236_v22, 0.0 }
  0x4c   :  { %v251_v29 = vadd.f32 %v250_v20, %v247_v23  ;;  %v264_v30 = vstv %s391_s20  ;;  %s397_s25 = sld [smem:[#allocation2 + $0x40]] }
  0x4d   :  { %v262_v31 = vadd.f32 %v261_v27, %v259_v26  ;;  %v265_v32 = vmul.f32 %v264_v30, %v543_v42  ;;  %v268_v33 = vstv %s392_s1  ;;  %s560_s26 = sld [smem:[#allocation2 + $0x42]] }
  0x4e   :  { %v255_v35 = vadd.f32 %v254_v24, %v251_v29  ;;  %v269_v37 = vmul.f32 %v268_v33, %v546_v49  ;;  %v272_v38 = vstv %s393_s21  ;;  %s399_s27 = sld [smem:[#allocation2 + $0x3d]] }
  0x4f   :  { %v266_v39 = vadd.f32 %v265_v32, %v262_v31  ;;  %v273_v36 = vmul.f32 %v272_v38, %v199_v61  ;;  %v277_v40 = vstv %s394_s22  ;;  %s400_s28 = sld [smem:[#allocation2 + $0x45]] }
  0x50   :  { %v256_v41 = vmax.f32 %v255_v35, 0.0  ;;  %v278_v43 = vmul.f32 %v277_v40, %v218_v28  ;;  %v280_v45 = vstv %s395_s23  ;;  %s401_s29 = sld [smem:[#allocation2 + $0x3f]] }
  0x51   :  { %v270_v46 = vadd.f32 %v269_v37, %v266_v39  ;;  %v283_v42 = vstv %s396_s24  ;;  %s402_s30 = sld [smem:[#allocation2 + $0x41]] }
  0x52   :  { %v281_v44 = vadd.f32 %v280_v45, %v278_v43  ;;  %v284_v47 = vmul.f32 %v283_v42, %v237_v34  ;;  %v287_v48 = vstv %s397_s25  ;;  %s403_s3 = sld [smem:[#allocation2 + $0x43]] }
  0x53   :  { %v274_v51 = vadd.f32 %v273_v36, %v270_v46  ;;  %v288_v49 = vmul.f32 %v287_v48, %v256_v41  ;;  %v291_v50 = vstv %s560_s26 }
  0x54   :  { %v285_v52 = vadd.f32 %v284_v47, %v281_v44  ;;  %v295_v53 = vstv %s399_s27 }
  0x55   :  { %v275_v54 = vmax.f32 %v274_v51, 0.0  ;;  %v296_v55 = vmul.f32 %v295_v53, %v218_v28  ;;  %v298_v56 = vstv %s400_s28 }
  0x56   :  { %v289_v57 = vadd.f32 %v288_v49, %v285_v52  ;;  %v301_v58 = vstv %s401_s29 }
  0x57   :  { %v292_v59 = vmul.f32 %v291_v50, %v275_v54  ;;  %v299_v60 = vadd.f32 %v298_v56, %v296_v55  ;;  %v302_v61 = vmul.f32 %v301_v58, %v237_v34  ;;  %v305_v62 = vstv %s402_s30 }
  0x58   :  { %v306_v63 = vmul.f32 %v305_v62, %v256_v41  ;;  %v309_v0 = vstv %s403_s3 }
  0x59   :  { %v293_v1 = vadd.f32 %v292_v59, %v289_v57  ;;  %v303_v2 = vadd.f32 %v302_v61, %v299_v60  ;;  %v310_v3 = vmul.f32 %v309_v0, %v275_v54 }
  0x5b   :  { %v307_v4 = vadd.f32 %v306_v63, %v303_v2  ;;  %312 = vst [vmem:[#allocation7] sm:$0xff] %v293_v1 }
  0x5d   :  { %v311_v5 = vadd.f32 %v310_v3, %v307_v4 }
  0x5f   :  { %314 = vst [vmem:[#allocation7 + $0x8] sm:$0xff] %v311_v5 }
  0x60   :  { %327 = dma.vmem_to_hbm [thread:$0]  %s320_s5, 256, %s322_s8, [#allocation4], %s477_s18, %s477_s18, %s478_s19  }
  0x61   :  { %473 = dma.done.wait [#allocation4], 256  }
  0x62   :  { %474 = vsyncadd [#allocation4], 4294967040 }
  0x63   :  { %332 = vsyncpa [#allocation3], 1 }
  0x64   :  { %333 = vsyncpa [#allocation4], 1 }
  0x65   :  { %334 = vsyncpa [#allocation5], 1 }

</bundles_post_ra>
